<compile_context>
chip_gen: v5e
topology: v5e:2x2
jax: 0.10.0
libtpu: 0.0.40
codegen_flags: <defaults>
</compile_context>

<pallas_src>
import functools

import jax
import jax.numpy as jnp
from jax.experimental import pallas as pl
from jax.experimental.pallas import tpu as pltpu


def _pair(v):
    if isinstance(v, (tuple, list)):
        assert len(v) == 2, "stride/padding must be an int or a 2-tuple"
        return int(v[0]), int(v[1])
    return int(v), int(v)


def _num_tensorcores() -> int:
    # v5e/v6e expose one TensorCore per device; dual-TC parts (v7x-style) may
    # report more.  Fallback of 1 folds the whole batch (right for v5e/v6e).
    try:
        return max(1, int(getattr(jax.devices()[0], "num_cores", 1)))
    except Exception:  # pragma: no cover
        return 1


def _conv_matmul_relu_kernel(w_ref, b_ref, p_ref, o_ref, *, nb):
    # w_ref: (C_out, K)          flattened weights, grid-invariant (VMEM resident)
    # b_ref: (C_out, 1)          bias column (zeros if bias=False), grid-invariant
    # p_ref: (nb, K, M_pad)      transposed im2col slab (lane dim = M_pad, 128-dense)
    # o_ref: (nb, C_out, M_pad)  lane-dense output; reshapes straight to NCHW outside
    w = w_ref[...]
    b = b_ref[...]
    for i in range(nb):  # nb is a small compile-time constant; statically unrolled
        acc = jnp.dot(w, p_ref[i], preferred_element_type=jnp.float32)  # (C_out, M_pad)
        o_ref[i] = jnp.maximum(acc + b, 0.0).astype(o_ref.dtype)        # bias + ReLU, f32


@functools.partial(
    jax.jit, static_argnames=("stride", "padding", "batch_block", "use_bf16_matmul"))
def create_conv_forward(x_nchw, weight_oihw, bias, *, stride, padding,
                        batch_block=None, use_bf16_matmul=False):
    """Conv2d(stride, padding) + ReLU.  x: (N, C_in, H, W) -> (N, C_out, H_out, W_out)."""
    n, c_in, h, w = x_nchw.shape
    c_out, c_in_w, kh_size, kw_size = weight_oihw.shape
    assert c_in == c_in_w
    sh, sw = _pair(stride)
    ph, pw = _pair(padding)
    h_out = (h + 2 * ph - kh_size) // sh + 1
    w_out = (w + 2 * pw - kw_size) // sw + 1
    m = h_out * w_out
    k = kh_size * kw_size * c_in
    m_pad = ((m + 127) // 128) * 128          # lane-dense output slab

    # Batch folding: one grid step per TensorCore; grid=1 on single-TC chips.
    if batch_block is None:
        n_tc = _num_tensorcores()
        batch_block = n // n_tc if (n_tc > 1 and n % n_tc == 0) else n
    nb = int(batch_block)
    assert n % nb == 0, "batch_block must divide N"
    grid_len = n // nb

    # ---- layout plumbing in plain JAX (fused under this jit) -----------------
    # Transposed im2col slab (N, K, M): k ordered (kh, kw, c_in), lane dim = M.
    # Built straight from NCHW -- no input transpose needed.
    x_pad = jnp.pad(x_nchw, ((0, 0), (0, 0), (ph, ph), (pw, pw)))
    taps = []
    for kh in range(kh_size):
        for kw in range(kw_size):
            taps.append(x_pad[:, :,
                              kh: kh + sh * (h_out - 1) + 1: sh,
                              kw: kw + sw * (w_out - 1) + 1: sw])  # (N, C_in, H_out, W_out)
    patches_t = jnp.stack(taps, axis=1).reshape(n, k, m)           # (N, K, M)
    if m_pad != m:
        patches_t = jnp.pad(patches_t, ((0, 0), (0, 0), (0, m_pad - m)))

    # (C_out, C_in, KH, KW) -> (C_out, KH, KW, C_in) -> (C_out, K); matches the
    # (kh, kw, c_in) ordering of the slab's K axis.
    w_t = jnp.transpose(weight_oihw, (0, 2, 3, 1)).reshape(c_out, k)

    if bias is None:
        bias = jnp.zeros((c_out,), dtype=jnp.float32)
    b_col = bias.reshape(c_out, 1).astype(jnp.float32)

    if use_bf16_matmul:
        # Halves patch DMA bytes / VMEM; accuracy drops to ~bf16 (fails 1e-4 checks).
        patches_t = patches_t.astype(jnp.bfloat16)
        w_t = w_t.astype(jnp.bfloat16)

    # VMEM budget from the actual block footprint (conservatively assume every
    # block is double-buffered) + headroom for Mosaic internal scratch.
    out_dtype = x_nchw.dtype
    in_bytes = patches_t.dtype.itemsize
    out_bytes = jnp.dtype(out_dtype).itemsize
    footprint = 2 * (nb * k * m_pad * in_bytes            # patch block
                     + nb * c_out * m_pad * out_bytes     # output block
                     + c_out * k * in_bytes + c_out * 4)  # resident weight/bias
    vmem_limit = int(min(64 << 20, max(16 << 20, footprint + (4 << 20))))

    kernel = functools.partial(_conv_matmul_relu_kernel, nb=nb)

    out_t = pl.pallas_call(
        kernel,
        out_shape=jax.ShapeDtypeStruct((n, c_out, m_pad), out_dtype),
        grid_spec=pltpu.PrefetchScalarGridSpec(
            num_scalar_prefetch=0,
            grid=(grid_len,),
            in_specs=[
                pl.BlockSpec((c_out, k), lambda b: (0, 0)),         # weights, resident
                pl.BlockSpec((c_out, 1), lambda b: (0, 0)),         # bias, resident
                pl.BlockSpec((nb, k, m_pad), lambda b: (b, 0, 0)),  # patch slab
            ],
            out_specs=pl.BlockSpec((nb, c_out, m_pad), lambda b: (b, 0, 0)),
        ),
        compiler_params=pltpu.CompilerParams(
            dimension_semantics=("parallel",),
            vmem_limit_bytes=vmem_limit,
        ),
    )(w_t, b_col, patches_t)

    # (N, C_out, M_pad) -> crop -> (N, C_out, H_out, W_out).  Pure reshape: the
    # kernel output is already channel-major, so no output-transpose HLO.
    return out_t[:, :, :m].reshape(n, c_out, h_out, w_out)


if __name__ == "__main__":
    # Module config (bias=True) and small shapes consistent with the forward.
    in_channels, out_channels = 4, 8
    kernel_size, stride, padding = 3, 1, 1
    N, H, W = 2, 16, 16

    key = jax.random.PRNGKey(0)
    kx, kwt, kb = jax.random.split(key, 3)
    x = jax.random.normal(kx, (N, in_channels, H, W), dtype=jnp.float32)
    # Deterministic synthetic parameters (nn.Conv2d layout: OIHW weight, (O,) bias).
    weight = 0.1 * jax.random.normal(
        kwt, (out_channels, in_channels, kernel_size, kernel_size), dtype=jnp.float32)
    bias = 0.1 * jax.random.normal(kb, (out_channels,), dtype=jnp.float32)

    out = create_conv_forward(x, weight, bias, stride=stride, padding=padding)
    out = jax.block_until_ready(out)

    # Reference check against XLA's conv (same semantics as torch.nn.Conv2d NCHW) + ReLU.
    ref = jax.lax.conv_general_dilated(
        x, weight, window_strides=(stride, stride),
        padding=((padding, padding), (padding, padding)),
        dimension_numbers=("NCHW", "OIHW", "NCHW"),
    ) + bias.reshape(1, out_channels, 1, 1)
    ref = jnp.maximum(ref, 0.0)
    assert out.shape == ref.shape
    assert jnp.allclose(out, ref, atol=1e-4, rtol=1e-4), "mismatch vs reference conv"

    print("KERNEL_OK")
</pallas_src>

<mosaic_0001>
module attributes {stable_mosaic.version = 11 : i64} {
  func.func @_conv_matmul_relu_kernel(%arg0: i32, %arg1: memref<8x36xf32, #tpu.memory_space<vmem>>, %arg2: memref<8x1xf32, #tpu.memory_space<vmem>>, %arg3: memref<2x36x256xf32, #tpu.memory_space<vmem>>, %arg4: memref<2x8x256xf32, #tpu.memory_space<vmem>>) attributes {dimension_semantics = [#tpu.dimension_semantics<parallel>], iteration_bounds = array<i64: 1>, scalar_prefetch = 0 : i64, scratch_operands = 0 : i64, tpu.core_type = #tpu.core_type<tc>, window_params = [{pipeline_mode = #tpu.pipeline_mode<synchronous>, transform_indices = @transform_0, window_bounds = array<i64: 8, 36>}, {pipeline_mode = #tpu.pipeline_mode<synchronous>, transform_indices = @transform_1, window_bounds = array<i64: 8, 1>}, {transform_indices = @transform_2, window_bounds = array<i64: 2, 36, 256>}, {transform_indices = @transform_3, window_bounds = array<i64: 2, 8, 256>}]} {
    %c0 = arith.constant 0 : index
    %c0_0 = arith.constant 0 : index
    %0 = vector.load %arg1[%c0, %c0_0] : memref<8x36xf32, #tpu.memory_space<vmem>>, vector<8x36xf32>
    %c0_1 = arith.constant 0 : index
    %c0_2 = arith.constant 0 : index
    %1 = vector.load %arg2[%c0_1, %c0_2] : memref<8x1xf32, #tpu.memory_space<vmem>>, vector<8x1xf32>
    %c0_3 = arith.constant 0 : index
    %c0_4 = arith.constant 0 : index
    %c0_5 = arith.constant 0 : index
    %2 = vector.load %arg3[%c0_3, %c0_4, %c0_5] : memref<2x36x256xf32, #tpu.memory_space<vmem>>, vector<1x36x256xf32>
    %3 = vector.shape_cast %2 : vector<1x36x256xf32> to vector<36x256xf32>
    %cst = arith.constant dense<0.000000e+00> : vector<8x256xf32>
    %4 = tpu.matmul %0, %3, %cst {dimension_numbers = #tpu.dot_dimension_numbers<[1], [0], [0], [1], [0, 0, 1, 1], [], []>} : vector<8x36xf32>, vector<36x256xf32>, vector<8x256xf32> -> vector<8x256xf32>
    %5 = vector.broadcast %1 : vector<8x1xf32> to vector<8x256xf32>
    %6 = arith.addf %4, %5 : vector<8x256xf32>
    %cst_6 = arith.constant 0.000000e+00 : f32
    %7 = vector.broadcast %cst_6 : f32 to vector<8x256xf32>
    %8 = arith.maximumf %6, %7 : vector<8x256xf32>
    %c0_7 = arith.constant 0 : index
    %c0_8 = arith.constant 0 : index
    %c0_9 = arith.constant 0 : index
    %9 = vector.load %arg4[%c0_7, %c0_8, %c0_9] : memref<2x8x256xf32, #tpu.memory_space<vmem>>, vector<1x8x256xf32>
    %10 = vector.shape_cast %9 : vector<1x8x256xf32> to vector<8x256xf32>
    %11 = vector.shape_cast %8 : vector<8x256xf32> to vector<1x8x256xf32>
    tpu.vector_store %arg4[%c0_7, %c0_8, %c0_9], %11 {strides = array<i32>} : memref<2x8x256xf32, #tpu.memory_space<vmem>>, vector<1x8x256xf32>,
    %c1 = arith.constant 1 : index
    %c0_10 = arith.constant 0 : index
    %c0_11 = arith.constant 0 : index
    %12 = vector.load %arg3[%c1, %c0_10, %c0_11] : memref<2x36x256xf32, #tpu.memory_space<vmem>>, vector<1x36x256xf32>
    %13 = vector.shape_cast %12 : vector<1x36x256xf32> to vector<36x256xf32>
    %cst_12 = arith.constant dense<0.000000e+00> : vector<8x256xf32>
    %14 = tpu.matmul %0, %13, %cst_12 {dimension_numbers = #tpu.dot_dimension_numbers<[1], [0], [0], [1], [0, 0, 1, 1], [], []>} : vector<8x36xf32>, vector<36x256xf32>, vector<8x256xf32> -> vector<8x256xf32>
    %15 = vector.broadcast %1 : vector<8x1xf32> to vector<8x256xf32>
    %16 = arith.addf %14, %15 : vector<8x256xf32>
    %cst_13 = arith.constant 0.000000e+00 : f32
    %17 = vector.broadcast %cst_13 : f32 to vector<8x256xf32>
    %18 = arith.maximumf %16, %17 : vector<8x256xf32>
    %c1_14 = arith.constant 1 : index
    %c0_15 = arith.constant 0 : index
    %c0_16 = arith.constant 0 : index
    %19 = vector.load %arg4[%c1_14, %c0_15, %c0_16] : memref<2x8x256xf32, #tpu.memory_space<vmem>>, vector<1x8x256xf32>
    %20 = vector.shape_cast %19 : vector<1x8x256xf32> to vector<8x256xf32>
    %21 = vector.shape_cast %18 : vector<8x256xf32> to vector<1x8x256xf32>
    tpu.vector_store %arg4[%c1_14, %c0_15, %c0_16], %21 {strides = array<i32>} : memref<2x8x256xf32, #tpu.memory_space<vmem>>, vector<1x8x256xf32>,
    return
  }
  func.func @transform_0(%arg0: i32) -> (i32, i32) {
    %c0_i32 = arith.constant 0 : i32
    %c0_i32_0 = arith.constant 0 : i32
    %c0_i32_1 = arith.constant 0 : i32
    return %c0_i32, %c0_i32_0 : i32, i32
  }
  func.func @transform_1(%arg0: i32) -> (i32, i32) {
    %c0_i32 = arith.constant 0 : i32
    %c0_i32_0 = arith.constant 0 : i32
    %c0_i32_1 = arith.constant 0 : i32
    return %c0_i32, %c0_i32_0 : i32, i32
  }
  func.func @transform_2(%arg0: i32) -> (i32, i32, i32) {
    %c0_i32 = arith.constant 0 : i32
    %c0_i32_0 = arith.constant 0 : i32
    %c0_i32_1 = arith.constant 0 : i32
    return %arg0, %c0_i32, %c0_i32_0 : i32, i32, i32
  }
  func.func @transform_3(%arg0: i32) -> (i32, i32, i32) {
    %c0_i32 = arith.constant 0 : i32
    %c0_i32_0 = arith.constant 0 : i32
    %c0_i32_1 = arith.constant 0 : i32
    return %arg0, %c0_i32, %c0_i32_0 : i32, i32, i32
  }
}

</mosaic_0001>

<bundles_post_ra>
// kernel: create_conv_forward.1
= control target key start
LH: loop header
LB: loop body
LE: loop exit
PB: predicated region body
PF: predicated region fallthrough
CT: control target
= control target key end

     0   :  { %vm35_vm0 = vcmask 1043456   ;;  %v174_v3 = vmov 0   ;;  %vm31_vm1 = vcmask 293888   ;;  %s281_s2 = inlined_call_operand.vmem [shape: f32[2,36,256], index: 2, kind: input, shape index: {}]   ;;  %s282_s0 = inlined_call_operand.vmem [shape: f32[8,36], index: 0, kind: input, shape index: {}]   ;;  %s283_s1 = inlined_call_operand.vmem [shape: f32[8,1], index: 1, kind: input, shape index: {}]   ;;  %s284_s3 = inlined_call_operand.vmem [shape: f32[2,8,256], index: 3, kind: output, shape index: {}]  }
   0x1   :  { %v164_v0 = vld [vmem:[%s281_s2 + $0x90] sm:$0xf]  ;;  %v165_v1 = vld [vmem:[%s281_s2 + $0x98] sm:$0xf]  ;;  %v162_v2 = vld [vmem:[%s281_s2 + $0x80] sm:$0xff]  ;;  %173 = vset.pattern.permute.xlu0 %v174_v3 }
   0x2   :  { %166 = vmatpush.msk.msra.mxu2 %vm35_vm0, %v164_v0  ;;  %168 = vmatpush.msk.msra.mxu3 %vm35_vm0, %v165_v1  ;;  %v163_v4 = vld [vmem:[%s281_s2 + $0x88] sm:$0xff]  ;;  %v160_v5 = vld [vmem:[%s281_s2 + $0x70] sm:$0xff]  ;;  %v161_v6 = vld [vmem:[%s281_s2 + $0x78] sm:$0xff] }
   0x3   :  { %v24_v7 = vld [vmem:[%s281_s2 + $0x40] sm:$0xf]  ;;  %v25_v8 = vld [vmem:[%s281_s2 + $0x48] sm:$0xf]  ;;  %v22_v9 = vld [vmem:[%s281_s2 + $0x30] sm:$0xff] }
   0x4   :  { %115 = vmatpush.msra.mxu2 %v162_v2  ;;  %135 = vmatpush.msra.mxu3 %v163_v4  ;;  %v23_v10 = vld [vmem:[%s281_s2 + $0x38] sm:$0xff]  ;;  %v158_v11 = vld [vmem:[%s281_s2 + $0x60] sm:$0xff]  ;;  %v159_v12 = vld [vmem:[%s281_s2 + $0x68] sm:$0xff] }
   0x5   :  { %152 = vmatpush.msk.msra.mxu0 %vm35_vm0, %v24_v7  ;;  %154 = vmatpush.msk.msra.mxu1 %vm35_vm0, %v25_v8  ;;  %v20_v13 = vld [vmem:[%s281_s2 + $0x20] sm:$0xff]  ;;  %v21_v14 = vld [vmem:[%s281_s2 + $0x28] sm:$0xff]  ;;  %v156_v15 = vld [vmem:[%s281_s2 + $0x50] sm:$0xff] }
   0x6   :  { %116 = vmatpush.msra.mxu2 %v160_v5  ;;  %136 = vmatpush.msra.mxu3 %v161_v6  ;;  %v157_v16 = vld [vmem:[%s281_s2 + $0x58] sm:$0xff]  ;;  %v14_v17 = vld [vmem:[%s282_s0] sm:$0xff]  ;;  %v18_v18 = vld [vmem:[%s281_s2 + $0x10] sm:$0xff] }
   0x7   :  { %54 = vmatpush.msra.mxu0 %v22_v9  ;;  %74 = vmatpush.msra.mxu1 %v23_v10  ;;  %v19_v19 = vld [vmem:[%s281_s2 + $0x18] sm:$0xff]  ;;  %v15_v20 = vld [vmem:[%s283_s1] sm:$0xff]  ;;  %v17_v22 = vld [vmem:[%s281_s2 + $0x8] sm:$0xff] }
   0x8   :  { %117 = vmatpush.msra.mxu2 %v158_v11  ;;  %137 = vmatpush.msra.mxu3 %v159_v12  ;;  %v16_v21 = vld [vmem:[%s281_s2] sm:$0xff] }
   0x9   :  { %55 = vmatpush.msra.mxu0 %v20_v13  ;;  %75 = vmatpush.msra.mxu1 %v21_v14 }
   0xa   :  { %118 = vmatpush.msra.mxu2 %v156_v15  ;;  %138 = vmatpush.msra.mxu3 %v157_v16 }
   0xb   :  { %167 = vmatmul.msk.f32.vlgmr.msra.gmra.mxu2 %vm31_vm1, %v14_v17  ;;  %169 = vmatmul.msk.f32.vlgmr.msra.gmra.mxu3 %vm31_vm1, %v14_v17 }
   0xc   :  { %56 = vmatpush.msra.mxu0 %v18_v18  ;;  %76 = vmatpush.msra.mxu1 %v19_v19 }
   0xd   :  { %28 = vperm.xlu0 %173, %v15_v20  }
   0xe   :  { %57 = vmatpush.msra.mxu0 %v16_v21  ;;  %77 = vmatpush.msra.mxu1 %v17_v22 }
   0xf   :  { %153 = vmatmul.msk.f32.vlgmr.msra.gmra.mxu0 %vm31_vm1, %v14_v17  ;;  %155 = vmatmul.msk.f32.vlgmr.msra.gmra.mxu1 %vm31_vm1, %v14_v17 }
  0x7f   :  { %v29_v23 = vpop.permute.xlu0 %28 }
  0x8c   :  { %v59_v24 = vpop.f32.mrf.mxu0  ;;  %v79_v25 = vpop.f32.mrf.mxu1 }
  0x8d   :  { %v60_v26 = vadd.f32 %v59_v24, %v29_v23  ;;  %v80_v27 = vadd.f32 %v79_v25, %v29_v23 }
  0x8e   :  { %v120_v28 = vpop.f32.mrf.mxu2  ;;  %v140_v29 = vpop.f32.mrf.mxu3 }
  0x8f   :  { %v82_v30 = vmax.f32 %v60_v26, 0.0  ;;  %v83_v31 = vmax.f32 %v80_v27, 0.0  ;;  %v121_v32 = vadd.f32 %v120_v28, %v29_v23  ;;  %v141_v33 = vadd.f32 %v140_v29, %v29_v23 }
  0x91   :  { %84 = vst [vmem:[%s284_s3] sm:$0xff] %v82_v30  ;;  %v143_v34 = vmax.f32 %v121_v32, 0.0  ;;  %v144_v35 = vmax.f32 %v141_v33, 0.0 }
  0x92   :  { %85 = vst [vmem:[%s284_s3 + $0x8] sm:$0xff] %v83_v31 }
  0x93   :  { %170 = vst [vmem:[%s284_s3 + $0x10] sm:$0xff] %v143_v34 }
  0x94   :  { %171 = vst [vmem:[%s284_s3 + $0x18] sm:$0xff] %v144_v35 }

</bundles_post_ra>
